<compile_context>
chip_gen: v6e
topology: v6e:2x2x1
jax: 0.10.0
libtpu: 0.0.40
codegen_flags: <defaults>
</compile_context>

<pallas_src>
import functools

import jax
import jax.numpy as jnp
from jax.experimental import pallas as pl
from jax.experimental.pallas import tpu as pltpu

# ----- model constants (deterministic; undefined globals picked in-script) ----
TS = 0.0001
PRECIP = 1.845
WATER_EFFICIENCY = 0.449
SEEP_RATE = 0.1
UPTAKE_RATE = 0.05
ETA = 0.3
MORT_RATE = 0.02
Q = 2.0            # statically 2 -> use b*b in the kernel (avoids pow -> exp/log)
D2 = 0.2
D3 = 0.05
# (infilt_rate / flow_rate / evap_rate / d1 are set in __init__ but unused in forward)

# TS folded into the per-term coefficients (fewer VALU multiplies per element).
D2_TS = D2 * TS
D3_TS = D3 * TS
PRECIP_TS = PRECIP * TS
MORT_TS = MORT_RATE * TS
UPTAKE_TS = UPTAKE_RATE * TS
UPTAKE_ETA_TS = UPTAKE_RATE * ETA * TS
ONE_MINUS_SEEP_TS = 1.0 - SEEP_RATE * TS

# Above this HW the [HW, HW] stencil matrix (HW^2 * 4 B, double-buffered) gets
# too big to keep resident in VMEM -> fall back to the roll-based stencil.
_MXU_MAX_HW = 1024


# ------------------------------ shared update --------------------------------
def _reaction_step(w, b, t, lapl):
    """One Euler step.  `lapl` is the replicate-padded 5-point Laplacian."""
    b2 = b * b
    # uptake term (already * TS), shared by both equations; b**Q == b*b.
    growth_ts = (w * b) * (UPTAKE_TS + UPTAKE_ETA_TS * b2)
    w_new = (ONE_MINUS_SEEP_TS * w + PRECIP_TS) + (D2_TS * lapl(w) - growth_ts)
    b_new = b + (D3_TS * lapl(b) - MORT_TS * (t * b)
                 + WATER_EFFICIENCY * growth_ts)
    return w_new, b_new


def _run_steps(steps, w, b, t, lapl):
    if steps == 1:
        return _reaction_step(w, b, t, lapl)
    return jax.lax.fori_loop(
        0, steps, lambda _, c: _reaction_step(c[0], c[1], t, lapl), (w, b))


# ------------------------------- kernels --------------------------------------
def nca_mxu_kernel(steps, k_ref, w_ref, b_ref, t_ref, wo_ref, bo_ref):
    """Laplacian as x @ K on the MXU.  K is a resident [HW, HW] stencil."""
    k = k_ref[...]

    def lapl(x):
        return jnp.dot(x, k, preferred_element_type=jnp.float32)

    w, b = _run_steps(steps, w_ref[...], b_ref[...], t_ref[...], lapl)
    wo_ref[...] = w.astype(wo_ref.dtype)
    bo_ref[...] = b.astype(bo_ref.dtype)


def nca_roll_kernel(img_h, img_w, steps, w_ref, b_ref, t_ref, wo_ref, bo_ref):
    """Fallback for large images: Laplacian via 4 lane rolls + edge masks."""
    nb, hw = w_ref.shape

    # Edge masks: computed ONCE per grid step and shared by both Laplacians.
    # TODO(synk): hoist mask construction across grid steps (persistent VMEM
    # scratch under pl.when(program_id==0)) if this path ever matters on v7x.
    flat = jax.lax.broadcasted_iota(jnp.int32, (nb, hw), 1)
    if img_w & (img_w - 1) == 0:
        col = flat & (img_w - 1)             # power-of-two W: avoid integer mod
    else:
        col = flat % img_w
    top = flat < img_w                       # image row 0
    bot = flat >= (img_h - 1) * img_w        # image row H-1
    lft = col == 0                           # image col 0
    rgt = col == img_w - 1                   # image col W-1

    def lapl(x):
        # replicate padding: on an edge the "neighbor" is the pixel itself.
        up = jnp.where(top, x, pltpu.roll(x, shift=img_w, axis=1))
        dn = jnp.where(bot, x, pltpu.roll(x, shift=hw - img_w, axis=1))
        le = jnp.where(lft, x, pltpu.roll(x, shift=1, axis=1))
        rg = jnp.where(rgt, x, pltpu.roll(x, shift=hw - 1, axis=1))
        return (up + dn) + (le + rg) - 4.0 * x

    w, b = _run_steps(steps, w_ref[...], b_ref[...], t_ref[...], lapl)
    wo_ref[...] = w.astype(wo_ref.dtype)
    bo_ref[...] = b.astype(bo_ref.dtype)


# ------------------------------- wrapper ---------------------------------------
def _build_stencil(img_h, img_w, dtype):
    """[HW, HW] matrix K with lap(x) == x @ K (replicate-padded 5-point stencil)."""
    hw = img_h * img_w
    idx = jnp.arange(hw)
    row = idx // img_w
    col = idx % img_w
    up = jnp.where(row == 0, idx, idx - img_w)
    dn = jnp.where(row == img_h - 1, idx, idx + img_w)
    lf = jnp.where(col == 0, idx, idx - 1)
    rg = jnp.where(col == img_w - 1, idx, idx + 1)
    k = jnp.zeros((hw, hw), dtype)
    k = k.at[up, idx].add(1.0)
    k = k.at[dn, idx].add(1.0)
    k = k.at[lf, idx].add(1.0)
    k = k.at[rg, idx].add(1.0)
    k = k.at[idx, idx].add(-4.0)
    return k


def _choose_batch_block(n, img_bytes, k_bytes):
    """Images per grid step.

    Budget: 5 arrays (w, b, t, wo, bo) x 2 pipeline buffers x block plus the
    2x resident stencil matrix must stay under the scoped-VMEM limit requested
    below (~2 MiB per buffer target).  Keep the sublane dim a multiple of 8,
    and for N >= 16 leave >= 2 grid steps so both v7x TensorCores get work
    (grid axis is 'parallel').  The grid is ragged (pl.cdiv) instead of a
    whole-batch fallback.
    """
    if n < 16:
        # Tiny batch: whole-batch block (full-dim blocks sidestep the (8,128)
        # alignment rule).  TODO(synk): per-core split for 2 <= N < 16 on v7x.
        return n
    budget = (20 << 20) - 2 * k_bytes              # ~20 MiB for the 10 buffers
    per_buf = max(budget // 10, 1 << 19)           # >= 512 KiB each
    nb = max(8, (per_buf // max(img_bytes, 1)) // 8 * 8)
    nb = min(nb, max(8, (n // 2) // 8 * 8))        # guarantee >= 2 grid steps
    return nb


def _prepare_t(T, shape4, n, hw, dtype):
    """Return T as either a full [N, HW] field or a compact [N, 1] column."""
    T = jnp.asarray(T, dtype)
    if T.ndim >= 2 and T.shape[-2:] == shape4[-2:]:
        # Full spatial temperature field.
        return jnp.broadcast_to(T, shape4).reshape(n, hw)
    # Spatially-constant T (python scalar, per-image scalar, [N,1,1,1], ...):
    # keep it compact so the kernel doesn't DMA a full-size broadcast each step.
    t4 = T.reshape(T.shape + (1,) * (4 - T.ndim)) if T.ndim < 4 else T
    return jnp.broadcast_to(t4, (n, 1, 1, 1)).reshape(n, 1)


def nca_forward(w, b, T, steps=1):
    """w, b, T: [N, 1, H, W] float32 -> (w_next, b_next), same shape.

    `steps > 1` fuses that many Euler steps in one kernel call (w/b stay
    on-chip, T held constant); steps=1 matches the PyTorch forward exactly.
    """
    N, C, H, W = w.shape
    assert C == 1
    HW = H * W
    dtype = w.dtype
    itemsize = dtype.itemsize

    # Zero-copy flatten: each image becomes one lane-dense row of length H*W.
    w2 = w.reshape(N, HW)
    b2 = b.reshape(N, HW)
    t2 = _prepare_t(T, w.shape, N, HW, dtype)
    TW = t2.shape[1]

    use_mxu = HW <= _MXU_MAX_HW
    k_bytes = HW * HW * itemsize if use_mxu else 0

    nb = _choose_batch_block(N, HW * itemsize, k_bytes)
    grid = (pl.cdiv(N, nb),)

    spec = pl.BlockSpec((nb, HW), lambda i: (i, 0))
    t_spec = pl.BlockSpec((nb, TW), lambda i: (i, 0))
    out_shape = jax.ShapeDtypeStruct((N, HW), dtype)

    # Explicit scoped-VMEM limit: 5 arrays x 2 buffers + resident stencil.
    block_bytes = nb * HW * itemsize
    vmem_est = 10 * block_bytes + 2 * k_bytes + (2 << 20)
    vmem_limit = int(min(max(vmem_est, 32 << 20), 100 << 20))
    # TODO(synk): very large images (HW*nb blocks past VMEM) need H-row halo
    # tiling of the flattened axis instead of the whole-HW block taken here.

    compiler_params = pltpu.CompilerParams(
        dimension_semantics=("parallel",),
        vmem_limit_bytes=vmem_limit,
    )

    if use_mxu:
        k_mat = _build_stencil(H, W, dtype)
        k_spec = pl.BlockSpec((HW, HW), lambda i: (0, 0))   # constant -> resident
        kernel = functools.partial(nca_mxu_kernel, steps)
        in_specs = [k_spec, spec, spec, t_spec]
        args = (k_mat, w2, b2, t2)
    else:
        kernel = functools.partial(nca_roll_kernel, H, W, steps)
        in_specs = [spec, spec, t_spec]
        args = (w2, b2, t2)

    # TODO(synk): when driven step-by-step from a scan, add
    # input_output_aliases to update w/b in place.
    w_next, b_next = pl.pallas_call(
        kernel,
        out_shape=(out_shape, out_shape),
        grid_spec=pltpu.PrefetchScalarGridSpec(
            num_scalar_prefetch=0,
            grid=grid,
            in_specs=in_specs,
            out_specs=[spec, spec],
        ),
        compiler_params=compiler_params,
    )(*args)

    return w_next.reshape(N, 1, H, W), b_next.reshape(N, 1, H, W)


# ----------------------------- pure-JAX reference -----------------------------
def _lapl_ref(x):  # x: [N, 1, H, W]
    xp = jnp.pad(x, ((0, 0), (0, 0), (1, 1), (1, 1)), mode="edge")
    return (
        xp[:, :, :-2, 1:-1]
        + xp[:, :, 2:, 1:-1]
        + xp[:, :, 1:-1, :-2]
        + xp[:, :, 1:-1, 2:]
        - 4.0 * x
    )


def nca_ref(w, b, T):
    growth = UPTAKE_RATE * w * b * (1.0 + ETA * b**Q)
    dw = (D2 * _lapl_ref(w) - SEEP_RATE * w + PRECIP - growth) * TS
    db = (D3 * _lapl_ref(b) - MORT_RATE * T * b + WATER_EFFICIENCY * growth) * TS
    return w + dw, b + db


if __name__ == "__main__":
    key = jax.random.PRNGKey(0)
    kw, kb, kt = jax.random.split(key, 3)
    N, H, W = 2, 16, 16
    w = jnp.abs(jax.random.normal(kw, (N, 1, H, W), dtype=jnp.float32))
    b = jnp.abs(jax.random.normal(kb, (N, 1, H, W), dtype=jnp.float32))
    T = jnp.abs(jax.random.normal(kt, (N, 1, H, W), dtype=jnp.float32)) * 30.0

    w_ref_out, b_ref_out = nca_ref(w, b, T)

    w_out, b_out = nca_forward(w, b, T)
    jax.block_until_ready((w_out, b_out))

    assert jnp.allclose(w_out, w_ref_out, atol=1e-5, rtol=1e-5)
    assert jnp.allclose(b_out, b_ref_out, atol=1e-5, rtol=1e-5)

    print("KERNEL_OK")
</pallas_src>

<mosaic_0001>
module attributes {stable_mosaic.version = 11 : i64} {
  func.func @nca_mxu_kernel(%arg0: i32, %arg1: memref<256x256xf32, #tpu.memory_space<vmem>>, %arg2: memref<2x256xf32, #tpu.memory_space<vmem>>, %arg3: memref<2x256xf32, #tpu.memory_space<vmem>>, %arg4: memref<2x256xf32, #tpu.memory_space<vmem>>, %arg5: memref<2x256xf32, #tpu.memory_space<vmem>>, %arg6: memref<2x256xf32, #tpu.memory_space<vmem>>) attributes {dimension_semantics = [#tpu.dimension_semantics<parallel>], iteration_bounds = array<i64: 1>, scalar_prefetch = 0 : i64, scratch_operands = 0 : i64, tpu.core_type = #tpu.core_type<tc>, window_params = [{pipeline_mode = #tpu.pipeline_mode<synchronous>, transform_indices = @transform_0, window_bounds = array<i64: 256, 256>}, {transform_indices = @transform_1, window_bounds = array<i64: 2, 256>}, {transform_indices = @transform_2, window_bounds = array<i64: 2, 256>}, {transform_indices = @transform_3, window_bounds = array<i64: 2, 256>}, {transform_indices = @transform_4, window_bounds = array<i64: 2, 256>}, {transform_indices = @transform_5, window_bounds = array<i64: 2, 256>}]} {
    %c0 = arith.constant 0 : index
    %c0_0 = arith.constant 0 : index
    %0 = vector.load %arg1[%c0, %c0_0] : memref<256x256xf32, #tpu.memory_space<vmem>>, vector<256x256xf32>
    %c0_1 = arith.constant 0 : index
    %c0_2 = arith.constant 0 : index
    %1 = vector.load %arg2[%c0_1, %c0_2] : memref<2x256xf32, #tpu.memory_space<vmem>>, vector<2x256xf32>
    %c0_3 = arith.constant 0 : index
    %c0_4 = arith.constant 0 : index
    %2 = vector.load %arg3[%c0_3, %c0_4] : memref<2x256xf32, #tpu.memory_space<vmem>>, vector<2x256xf32>
    %c0_5 = arith.constant 0 : index
    %c0_6 = arith.constant 0 : index
    %3 = vector.load %arg4[%c0_5, %c0_6] : memref<2x256xf32, #tpu.memory_space<vmem>>, vector<2x256xf32>
    %4 = arith.mulf %2, %2 : vector<2x256xf32>
    %5 = arith.mulf %1, %2 : vector<2x256xf32>
    %cst = arith.constant 1.500000e-06 : f32
    %6 = vector.broadcast %cst : f32 to vector<2x256xf32>
    %7 = arith.mulf %6, %4 : vector<2x256xf32>
    %cst_7 = arith.constant 5.000000e-06 : f32
    %8 = vector.broadcast %cst_7 : f32 to vector<2x256xf32>
    %9 = arith.addf %8, %7 : vector<2x256xf32>
    %10 = arith.mulf %5, %9 : vector<2x256xf32>
    %cst_8 = arith.constant 0.999989986 : f32
    %11 = vector.broadcast %cst_8 : f32 to vector<2x256xf32>
    %12 = arith.mulf %11, %1 : vector<2x256xf32>
    %cst_9 = arith.constant 1.845000e-04 : f32
    %13 = vector.broadcast %cst_9 : f32 to vector<2x256xf32>
    %14 = arith.addf %12, %13 : vector<2x256xf32>
    %cst_10 = arith.constant dense<0.000000e+00> : vector<2x256xf32>
    %15 = tpu.matmul %1, %0, %cst_10 {dimension_numbers = #tpu.dot_dimension_numbers<[1], [0], [0], [1], [0, 0, 1, 1], [], []>} : vector<2x256xf32>, vector<256x256xf32>, vector<2x256xf32> -> vector<2x256xf32>
    %cst_11 = arith.constant 2.000000e-05 : f32
    %16 = vector.broadcast %cst_11 : f32 to vector<2x256xf32>
    %17 = arith.mulf %16, %15 : vector<2x256xf32>
    %18 = arith.subf %17, %10 : vector<2x256xf32>
    %19 = arith.addf %14, %18 : vector<2x256xf32>
    %cst_12 = arith.constant dense<0.000000e+00> : vector<2x256xf32>
    %20 = tpu.matmul %2, %0, %cst_12 {dimension_numbers = #tpu.dot_dimension_numbers<[1], [0], [0], [1], [0, 0, 1, 1], [], []>} : vector<2x256xf32>, vector<256x256xf32>, vector<2x256xf32> -> vector<2x256xf32>
    %cst_13 = arith.constant 5.000000e-06 : f32
    %21 = vector.broadcast %cst_13 : f32 to vector<2x256xf32>
    %22 = arith.mulf %21, %20 : vector<2x256xf32>
    %23 = arith.mulf %3, %2 : vector<2x256xf32>
    %cst_14 = arith.constant 2.000000e-06 : f32
    %24 = vector.broadcast %cst_14 : f32 to vector<2x256xf32>
    %25 = arith.mulf %24, %23 : vector<2x256xf32>
    %26 = arith.subf %22, %25 : vector<2x256xf32>
    %cst_15 = arith.constant 4.490000e-01 : f32
    %27 = vector.broadcast %cst_15 : f32 to vector<2x256xf32>
    %28 = arith.mulf %27, %10 : vector<2x256xf32>
    %29 = arith.addf %26, %28 : vector<2x256xf32>
    %30 = arith.addf %2, %29 : vector<2x256xf32>
    %c0_16 = arith.constant 0 : index
    %c0_17 = arith.constant 0 : index
    %31 = vector.load %arg5[%c0_16, %c0_17] : memref<2x256xf32, #tpu.memory_space<vmem>>, vector<2x256xf32>
    tpu.vector_store %arg5[%c0_16, %c0_17], %19 {strides = array<i32>} : memref<2x256xf32, #tpu.memory_space<vmem>>, vector<2x256xf32>,
    %c0_18 = arith.constant 0 : index
    %c0_19 = arith.constant 0 : index
    %32 = vector.load %arg6[%c0_18, %c0_19] : memref<2x256xf32, #tpu.memory_space<vmem>>, vector<2x256xf32>
    tpu.vector_store %arg6[%c0_18, %c0_19], %30 {strides = array<i32>} : memref<2x256xf32, #tpu.memory_space<vmem>>, vector<2x256xf32>,
    return
  }
  func.func @transform_0(%arg0: i32) -> (i32, i32) {
    %c0_i32 = arith.constant 0 : i32
    %c0_i32_0 = arith.constant 0 : i32
    %c0_i32_1 = arith.constant 0 : i32
    return %c0_i32, %c0_i32_0 : i32, i32
  }
  func.func @transform_1(%arg0: i32) -> (i32, i32) {
    %c0_i32 = arith.constant 0 : i32
    %c0_i32_0 = arith.constant 0 : i32
    return %arg0, %c0_i32 : i32, i32
  }
  func.func @transform_2(%arg0: i32) -> (i32, i32) {
    %c0_i32 = arith.constant 0 : i32
    %c0_i32_0 = arith.constant 0 : i32
    return %arg0, %c0_i32 : i32, i32
  }
  func.func @transform_3(%arg0: i32) -> (i32, i32) {
    %c0_i32 = arith.constant 0 : i32
    %c0_i32_0 = arith.constant 0 : i32
    return %arg0, %c0_i32 : i32, i32
  }
  func.func @transform_4(%arg0: i32) -> (i32, i32) {
    %c0_i32 = arith.constant 0 : i32
    %c0_i32_0 = arith.constant 0 : i32
    return %arg0, %c0_i32 : i32, i32
  }
  func.func @transform_5(%arg0: i32) -> (i32, i32) {
    %c0_i32 = arith.constant 0 : i32
    %c0_i32_0 = arith.constant 0 : i32
    return %arg0, %c0_i32 : i32, i32
  }
}

</mosaic_0001>

<bundles_post_ra>
// kernel: tpu_custom_call.1
= control target key start
LH: loop header
LB: loop body
LE: loop exit
PB: predicated region body
PF: predicated region fallthrough
CT: control target
= control target key end

     0   :  { %11 = vsyncpa [#allocation3], 0  ;;  %s587_s0 = inlined_call_operand.hbm [shape: f32[256,256], index: 0, kind: input, shape index: {}]   ;;  %s588_s1 = inlined_call_operand.hbm [shape: f32[2,256], index: 1, kind: input, shape index: {}]   ;;  %s589_s2 = inlined_call_operand.hbm [shape: f32[2,256], index: 2, kind: input, shape index: {}]   ;;  %s590_s3 = inlined_call_operand.vmem [shape: f32[2,256], index: 3, kind: input, shape index: {}]   ;;  %s591_s4 = inlined_call_operand.hbm [shape: f32[2,256], index: 4, kind: output, shape index: {0}]   ;;  %s592_s5 = inlined_call_operand.hbm [shape: f32[2,256], index: 5, kind: output, shape index: {1}]  }
   0x1   :  { %12 = vsyncpa [#allocation6], 0 }
   0x2   :  { %13 = vsyncpa [#allocation4], 0 }
   0x3   :  { %14 = vsyncpa [#allocation10], 0  ;;  %s514_s18 = smov [#allocation5]   ;;  %s515_s20 = smov [#allocation2]  }
   0x4   :  { %s33_s19 = sshll.u32 %s514_s18, 4  ;;  %s20_s21 = sshll.u32 %s515_s20, 4  ;;  %s34_s19 = int_to_ptr.vmem [resolvable:$true] %s33_s19  ;;  %s21_s21 = int_to_ptr.vmem [resolvable:$true] %s20_s21 }
   0x5   :  { %s414_s22 = scalar_lea.vmem %s34_s19, 64  ;;  %p419_p1 = scmp.lt.s32.totalorder %s34_s19, %s34_s19 }
   0x6   :  { %p415_p0 = scmp.ne.s32.totalorder %s34_s19, %s414_s22  ;;  %p420_p2 = scmp.lt.s32.totalorder %s414_s22, %s414_s22 }
   0x8   :  { %p421_p3 = por %p420_p2, %p419_p1 }
   0xa   :  { %p422_p4 = pnand %p421_p3, %p415_p0 }
   0xc   :  { %425 = shalt.err (!%p422_p4)
}
   0xd   :  { %36 = dma.hbm_to_vmem [thread:$0]  %s588_s1, 64, %s34_s19, [#allocation6]  }
   0xe   :  { %s434_s25 = scalar_lea.vmem %s21_s21, 8192  ;;  %p439_p6 = scmp.lt.s32.totalorder %s21_s21, %s21_s21 }
   0xf   :  { %p435_p5 = scmp.ne.s32.totalorder %s21_s21, %s434_s25  ;;  %p440_p7 = scmp.lt.s32.totalorder %s434_s25, %s434_s25 }
  0x11   :  { %p441_p8 = por %p440_p7, %p439_p6 }
  0x13   :  { %p442_p9 = pnand %p441_p8, %p435_p5 }
  0x15   :  { %445 = shalt.err (!%p442_p9)
}
  0x16   :  { %s516_s26 = smov 256   ;;  %s517_s27 = smov 16  }
  0x17   :  { %26 = dma.hbm_to_vmem [thread:$0]  %s587_s0, 8192, %s21_s21, [#allocation3], %s516_s26, %s516_s26, %s517_s27  }
  0x18   :  { %s518_s30 = smov [#allocation7]  }
  0x19   :  { %s43_s6 = sshll.u32 %s518_s30, 4  ;;  %s44_s6 = int_to_ptr.vmem [resolvable:$true] %s43_s6 }
  0x1a   :  { %s454_s7 = scalar_lea.vmem %s44_s6, 64  ;;  %p459_p11 = scmp.lt.s32.totalorder %s44_s6, %s44_s6 }
  0x1b   :  { %p455_p10 = scmp.ne.s32.totalorder %s44_s6, %s454_s7  ;;  %p460_p12 = scmp.lt.s32.totalorder %s454_s7, %s454_s7 }
  0x1d   :  { %p461_p13 = por %p460_p12, %p459_p11 }
  0x1f   :  { %p462_p0 = pnand %p461_p13, %p455_p10 }
  0x21   :  { %465 = shalt.err (!%p462_p0)
}
  0x22   :  { %46 = dma.hbm_to_vmem [thread:$0]  %s589_s2, 64, %s44_s6, [#allocation6]  }
  0x23   :  { %506 = dma.done.wait [#allocation3], 8192  }
  0x24   :  { %507 = vsyncadd [#allocation3], 4294959104 }
  0x25   :  { %508 = dma.done.wait [#allocation6], 128  }
  0x26   :  { %509 = vsyncadd [#allocation6], 4294967168  ;;  %v89_v0 = vld [vmem:[#allocation2 + $0xf8] sm:$0xff]  ;;  %v88_v1 = vld [vmem:[#allocation2 + $0xf0] sm:$0xff]  ;;  %v519_v47 = vmov 1983009808   ;;  %v136_v49 = vlaneseq }
  0x27   :  { %v87_v2 = vld [vmem:[#allocation2 + $0xe8] sm:$0xff]  ;;  %143 = vmatprep.subr.mxu0 %v89_v0  ;;  %252 = vmatprep.subr.mxu1 %v89_v0  ;;  %v86_v3 = vld [vmem:[#allocation2 + $0xe0] sm:$0xff]  ;;  %v85_v4 = vld [vmem:[#allocation2 + $0xd8] sm:$0xff]  ;;  %v134_v48 = vunpack.c.l.s4 %v519_v47  ;;  %s521_s10 = smov [#allocation9]  }
  0x28   :  { %144 = vmatpush1.msra.mxu0 %v88_v1  ;;  %253 = vmatpush1.msra.mxu1 %v88_v1  ;;  %v84_v5 = vld [vmem:[#allocation2 + $0xd0] sm:$0xff]  ;;  %v83_v6 = vld [vmem:[#allocation2 + $0xc8] sm:$0xff]  ;;  %v82_v7 = vld [vmem:[#allocation2 + $0xc0] sm:$0xff]  ;;  %v137_v55 = vshrl.u32 %v136_v49, 7  ;;  %s384_s11 = sshll.u32 %s521_s10, 4  ;;  %s385_s11 = int_to_ptr.vmem [resolvable:$true] %s384_s11 }
  0x29   :  { %145 = vmatprep.subr.mxu0 %v87_v2  ;;  %254 = vmatprep.subr.mxu1 %v87_v2  ;;  %v81_v8 = vld [vmem:[#allocation2 + $0xb8] sm:$0xff]  ;;  %v80_v9 = vld [vmem:[#allocation2 + $0xb0] sm:$0xff]  ;;  %v79_v10 = vld [vmem:[#allocation2 + $0xa8] sm:$0xff]  ;;  %v135_v54 = vunpack.c.0.s8 %v134_v48 }
  0x2a   :  { %146 = vmatpush1.msra.mxu0 %v86_v3  ;;  %255 = vmatpush1.msra.mxu1 %v86_v3  ;;  %v78_v11 = vld [vmem:[#allocation2 + $0xa0] sm:$0xff]  ;;  %v77_v12 = vld [vmem:[#allocation2 + $0x98] sm:$0xff]  ;;  %v76_v13 = vld [vmem:[#allocation2 + $0x90] sm:$0xff] }
  0x2b   :  { %147 = vmatprep.subr.mxu0 %v85_v4  ;;  %256 = vmatprep.subr.mxu1 %v85_v4  ;;  %v75_v14 = vld [vmem:[#allocation2 + $0x88] sm:$0xff]  ;;  %v74_v15 = vld [vmem:[#allocation2 + $0x80] sm:$0xff]  ;;  %v73_v16 = vld [vmem:[#allocation2 + $0x78] sm:$0xff]  ;;  %v561_v60 = vsub.s32 %v135_v54, %v137_v55 }
  0x2c   :  { %148 = vmatpush1.msra.mxu0 %v84_v5  ;;  %257 = vmatpush1.msra.mxu1 %v84_v5  ;;  %v72_v17 = vld [vmem:[#allocation2 + $0x70] sm:$0xff]  ;;  %v71_v18 = vld [vmem:[#allocation2 + $0x68] sm:$0xff]  ;;  %v70_v19 = vld [vmem:[#allocation2 + $0x60] sm:$0xff] }
  0x2d   :  { %149 = vmatprep.subr.mxu0 %v83_v6  ;;  %258 = vmatprep.subr.mxu1 %v83_v6  ;;  %v69_v20 = vld [vmem:[#allocation2 + $0x58] sm:$0xff]  ;;  %v68_v21 = vld [vmem:[#allocation2 + $0x50] sm:$0xff]  ;;  %v67_v22 = vld [vmem:[#allocation2 + $0x48] sm:$0xff] }
  0x2e   :  { %150 = vmatpush1.msra.mxu0 %v82_v7  ;;  %259 = vmatpush1.msra.mxu1 %v82_v7  ;;  %v66_v23 = vld [vmem:[#allocation2 + $0x40] sm:$0xff]  ;;  %v65_v24 = vld [vmem:[#allocation2 + $0x38] sm:$0xff]  ;;  %v64_v25 = vld [vmem:[#allocation2 + $0x30] sm:$0xff] }
  0x2f   :  { %151 = vmatprep.subr.mxu0 %v81_v8  ;;  %260 = vmatprep.subr.mxu1 %v81_v8  ;;  %v63_v26 = vld [vmem:[#allocation2 + $0x28] sm:$0xff]  ;;  %v62_v27 = vld [vmem:[#allocation2 + $0x20] sm:$0xff]  ;;  %v61_v28 = vld [vmem:[#allocation2 + $0x18] sm:$0xff] }
  0x30   :  { %152 = vmatpush1.msra.mxu0 %v80_v9  ;;  %261 = vmatpush1.msra.mxu1 %v80_v9  ;;  %v60_v29 = vld [vmem:[#allocation2 + $0x10] sm:$0xff]  ;;  %v59_v30 = vld [vmem:[#allocation2 + $0x8] sm:$0xff]  ;;  %v58_v31 = vld [vmem:[#allocation2] sm:$0xff] }
  0x31   :  { %153 = vmatprep.subr.mxu0 %v79_v10  ;;  %262 = vmatprep.subr.mxu1 %v79_v10  ;;  %v121_v32 = vld [vmem:[#allocation2 + $0x1f8] sm:$0xff]  ;;  %v120_v33 = vld [vmem:[#allocation2 + $0x1f0] sm:$0xff]  ;;  %v119_v34 = vld [vmem:[#allocation2 + $0x1e8] sm:$0xff] }
  0x32   :  { %154 = vmatpush1.msra.mxu0 %v78_v11  ;;  %263 = vmatpush1.msra.mxu1 %v78_v11  ;;  %v118_v35 = vld [vmem:[#allocation2 + $0x1e0] sm:$0xff]  ;;  %v117_v36 = vld [vmem:[#allocation2 + $0x1d8] sm:$0xff]  ;;  %v116_v37 = vld [vmem:[#allocation2 + $0x1d0] sm:$0xff] }
  0x33   :  { %155 = vmatprep.subr.mxu0 %v77_v12  ;;  %264 = vmatprep.subr.mxu1 %v77_v12  ;;  %v115_v38 = vld [vmem:[#allocation2 + $0x1c8] sm:$0xff]  ;;  %v114_v39 = vld [vmem:[#allocation2 + $0x1c0] sm:$0xff]  ;;  %v113_v40 = vld [vmem:[#allocation2 + $0x1b8] sm:$0xff] }
  0x34   :  { %156 = vmatpush1.msra.mxu0 %v76_v13  ;;  %265 = vmatpush1.msra.mxu1 %v76_v13  ;;  %v112_v41 = vld [vmem:[#allocation2 + $0x1b0] sm:$0xff]  ;;  %v111_v42 = vld [vmem:[#allocation2 + $0x1a8] sm:$0xff]  ;;  %v110_v43 = vld [vmem:[#allocation2 + $0x1a0] sm:$0xff] }
  0x35   :  { %157 = vmatprep.subr.mxu0 %v75_v14  ;;  %266 = vmatprep.subr.mxu1 %v75_v14  ;;  %v109_v44 = vld [vmem:[#allocation2 + $0x198] sm:$0xff]  ;;  %v108_v45 = vld [vmem:[#allocation2 + $0x190] sm:$0xff]  ;;  %v107_v46 = vld [vmem:[#allocation2 + $0x188] sm:$0xff] }
  0x36   :  { %158 = vmatpush1.msra.mxu0 %v74_v15  ;;  %267 = vmatpush1.msra.mxu1 %v74_v15  ;;  %v106_v50 = vld [vmem:[#allocation2 + $0x180] sm:$0xff]  ;;  %v105_v51 = vld [vmem:[#allocation2 + $0x178] sm:$0xff]  ;;  %v104_v52 = vld [vmem:[#allocation2 + $0x170] sm:$0xff] }
  0x37   :  { %159 = vmatprep.subr.mxu0 %v73_v16  ;;  %268 = vmatprep.subr.mxu1 %v73_v16  ;;  %v103_v53 = vld [vmem:[#allocation2 + $0x168] sm:$0xff]  ;;  %v102_v56 = vld [vmem:[#allocation2 + $0x160] sm:$0xff]  ;;  %v101_v57 = vld [vmem:[#allocation2 + $0x158] sm:$0xff] }
  0x38   :  { %160 = vmatpush1.msra.mxu0 %v72_v17  ;;  %269 = vmatpush1.msra.mxu1 %v72_v17  ;;  %v100_v58 = vld [vmem:[#allocation2 + $0x150] sm:$0xff]  ;;  %v99_v59 = vld [vmem:[#allocation2 + $0x148] sm:$0xff]  ;;  %v98_v61 = vld [vmem:[#allocation2 + $0x140] sm:$0xff] }
  0x39   :  { %161 = vmatprep.subr.mxu0 %v71_v18  ;;  %270 = vmatprep.subr.mxu1 %v71_v18  ;;  %v122_v62 = vld [vmem:[#allocation5] sm:$0xf]  ;;  %v97_v63 = vld [vmem:[#allocation2 + $0x138] sm:$0xff]  ;;  %v563_v0 = vld [vmem:[#allocation7] sm:$0xf] }
  0x3a   :  { %162 = vmatpush1.msra.mxu0 %v70_v19  ;;  %271 = vmatpush1.msra.mxu1 %v70_v19  ;;  %v96_v1 = vld [vmem:[#allocation2 + $0x130] sm:$0xff]  ;;  %v95_v2 = vld [vmem:[#allocation2 + $0x128] sm:$0xff]  ;;  %v139_v3 = vrot.slane %v122_v62, %v561_v60  ;;  %v94_v4 = vld [vmem:[#allocation2 + $0x120] sm:$0xff]  ;;  %v248_v5 = vrot.slane %v563_v0, %v561_v60  ;;  %v125_v12 = vmul.f32 %v563_v0, %v563_v0 }
  0x3b   :  { %163 = vmatprep.subr.mxu0 %v69_v20  ;;  %272 = vmatprep.subr.mxu1 %v69_v20  ;;  %v93_v6 = vld [vmem:[#allocation2 + $0x118] sm:$0xff]  ;;  %v92_v7 = vld [vmem:[#allocation2 + $0x110] sm:$0xff]  ;;  %v91_v8 = vld [vmem:[#allocation2 + $0x108] sm:$0xff]  ;;  %v126_v14 = vmul.f32 %v563_v0, %v122_v62 }
  0x3c   :  { %164 = vmatpush1.msra.mxu0 %v68_v21  ;;  %273 = vmatpush1.msra.mxu1 %v68_v21  ;;  %v140_v9 = vcombine.high %v139_v3, %v139_v3  ;;  %v90_v10 = vld [vmem:[#allocation2 + $0x100] sm:$0xff]  ;;  %v249_v11 = vcombine.high %v248_v5, %v248_v5  ;;  %v127_v13 = vmul.f32 1.5e-06, %v125_v12 }
  0x3d   :  { %165 = vmatprep.subr.mxu0 %v67_v22  ;;  %274 = vmatprep.subr.mxu1 %v67_v22  ;;  %v124_v16 = vld [vmem:[%s590_s3] sm:$0xf]  ;;  %s520_s3 = smov [#allocation8]  }
  0x3e   :  { %166 = vmatpush1.msra.mxu0 %v66_v23  ;;  %275 = vmatpush1.msra.mxu1 %v66_v23  ;;  %v128_v15 = vadd.f32 5e-06, %v127_v13  ;;  %v325_v17 = vmul.f32 %v124_v16, %v563_v0  ;;  %s374_s9 = sshll.u32 %s520_s3, 4  ;;  %s375_s9 = int_to_ptr.vmem [resolvable:$true] %s374_s9 }
  0x3f   :  { %167 = vmatprep.subr.mxu0 %v65_v24  ;;  %276 = vmatprep.subr.mxu1 %v65_v24  ;;  %s466_s12 = scalar_lea.vmem %s375_s9, 64  ;;  %p471_p2 = scmp.lt.s32.totalorder %s375_s9, %s375_s9 }
  0x40   :  { %168 = vmatpush1.msra.mxu0 %v64_v25  ;;  %277 = vmatpush1.msra.mxu1 %v64_v25  ;;  %v129_v18 = vmul.f32 %v128_v15, %v126_v14  ;;  %v326_v19 = vmul.f32 2e-06, %v325_v17  ;;  %p467_p1 = scmp.ne.s32.totalorder %s375_s9, %s466_s12  ;;  %p472_p3 = scmp.lt.s32.totalorder %s466_s12, %s466_s12 }
  0x41   :  { %169 = vmatprep.subr.mxu0 %v63_v26  ;;  %278 = vmatprep.subr.mxu1 %v63_v26 }
  0x42   :  { %170 = vmatpush1.msra.mxu0 %v62_v27  ;;  %279 = vmatpush1.msra.mxu1 %v62_v27  ;;  %v340_v20 = vmul.f32 0.449, %v129_v18  ;;  %v223_v21 = vrot.slane %v129_v18, %v561_v60  ;;  %v334_v22 = vrot.slane %v326_v19, %v561_v60  ;;  %p473_p4 = por %p472_p3, %p471_p2 }
  0x43   :  { %171 = vmatprep.subr.mxu0 %v61_v28  ;;  %280 = vmatprep.subr.mxu1 %v61_v28 }
  0x44   :  { %172 = vmatpush1.msra.mxu0 %v60_v29  ;;  %281 = vmatpush1.msra.mxu1 %v60_v29  ;;  %v348_v23 = vrot.slane %v340_v20, %v561_v60  ;;  %v224_v28 = vcombine.high %v223_v21, %v223_v21  ;;  %v335_v29 = vcombine.high %v334_v22, %v334_v22  ;;  %p474_p5 = pnand %p473_p4, %p467_p1 }
  0x45   :  { %173 = vmatprep.subr.mxu0 %v59_v30  ;;  %282 = vmatprep.subr.mxu1 %v59_v30 }
  0x46   :  { %174 = vmatpush1.msra.mxu0 %v58_v31  ;;  %283 = vmatpush1.msra.mxu1 %v58_v31 }
  0x47   :  { %175 = vmatprep.subr.mxu0 %v121_v32  ;;  %284 = vmatprep.subr.mxu1 %v121_v32  ;;  %v349_v32 = vcombine.high %v348_v23, %v348_v23 }
  0x48   :  { %176 = vmatpush2.msra.mxu0 %v120_v33  ;;  %285 = vmatpush2.msra.mxu1 %v120_v33  ;;  %v130_v33 = vmul.f32 0.99999, %v122_v62 }
  0x49   :  { %177 = vmatprep.subr.mxu0 %v119_v34  ;;  %286 = vmatprep.subr.mxu1 %v119_v34 }
  0x4a   :  { %178 = vmatpush2.msra.mxu0 %v118_v35  ;;  %287 = vmatpush2.msra.mxu1 %v118_v35 }
  0x4b   :  { %179 = vmatprep.subr.mxu0 %v117_v36  ;;  %288 = vmatprep.subr.mxu1 %v117_v36 }
  0x4c   :  { %180 = vmatpush2.msra.mxu0 %v116_v37  ;;  %289 = vmatpush2.msra.mxu1 %v116_v37 }
  0x4d   :  { %181 = vmatprep.subr.mxu0 %v115_v38  ;;  %290 = vmatprep.subr.mxu1 %v115_v38 }
  0x4e   :  { %182 = vmatpush2.msra.mxu0 %v114_v39  ;;  %291 = vmatpush2.msra.mxu1 %v114_v39 }
  0x4f   :  { %183 = vmatprep.subr.mxu0 %v113_v40  ;;  %292 = vmatprep.subr.mxu1 %v113_v40 }
  0x50   :  { %184 = vmatpush2.msra.mxu0 %v112_v41  ;;  %293 = vmatpush2.msra.mxu1 %v112_v41 }
  0x51   :  { %185 = vmatprep.subr.mxu0 %v111_v42  ;;  %294 = vmatprep.subr.mxu1 %v111_v42 }
  0x52   :  { %186 = vmatpush2.msra.mxu0 %v110_v43  ;;  %295 = vmatpush2.msra.mxu1 %v110_v43  ;;  %v131_v43 = vadd.f32 0.0001845, %v130_v33 }
  0x53   :  { %187 = vmatprep.subr.mxu0 %v109_v44  ;;  %296 = vmatprep.subr.mxu1 %v109_v44 }
  0x54   :  { %188 = vmatpush2.msra.mxu0 %v108_v45  ;;  %297 = vmatpush2.msra.mxu1 %v108_v45 }
  0x55   :  { %189 = vmatprep.subr.mxu0 %v107_v46  ;;  %298 = vmatprep.subr.mxu1 %v107_v46 }
  0x56   :  { %190 = vmatpush2.msra.mxu0 %v106_v50  ;;  %299 = vmatpush2.msra.mxu1 %v106_v50 }
  0x57   :  { %191 = vmatprep.subr.mxu0 %v105_v51  ;;  %300 = vmatprep.subr.mxu1 %v105_v51 }
  0x58   :  { %192 = vmatpush2.msra.mxu0 %v104_v52  ;;  %301 = vmatpush2.msra.mxu1 %v104_v52 }
  0x59   :  { %193 = vmatprep.subr.mxu0 %v103_v53  ;;  %302 = vmatprep.subr.mxu1 %v103_v53 }
  0x5a   :  { %194 = vmatpush2.msra.mxu0 %v102_v56  ;;  %303 = vmatpush2.msra.mxu1 %v102_v56 }
  0x5b   :  { %195 = vmatprep.subr.mxu0 %v101_v57  ;;  %304 = vmatprep.subr.mxu1 %v101_v57 }
  0x5c   :  { %196 = vmatpush2.msra.mxu0 %v100_v58  ;;  %305 = vmatpush2.msra.mxu1 %v100_v58 }
  0x5d   :  { %197 = vmatprep.subr.mxu0 %v99_v59  ;;  %306 = vmatprep.subr.mxu1 %v99_v59 }
  0x5e   :  { %198 = vmatpush2.msra.mxu0 %v98_v61  ;;  %307 = vmatpush2.msra.mxu1 %v98_v61 }
  0x5f   :  { %199 = vmatprep.subr.mxu0 %v97_v63  ;;  %308 = vmatprep.subr.mxu1 %v97_v63 }
  0x60   :  { %200 = vmatpush2.msra.mxu0 %v96_v1  ;;  %309 = vmatpush2.msra.mxu1 %v96_v1 }
  0x61   :  { %201 = vmatprep.subr.mxu0 %v95_v2  ;;  %310 = vmatprep.subr.mxu1 %v95_v2 }
  0x62   :  { %202 = vmatpush2.msra.mxu0 %v94_v4  ;;  %311 = vmatpush2.msra.mxu1 %v94_v4 }
  0x63   :  { %203 = vmatprep.subr.mxu0 %v93_v6  ;;  %312 = vmatprep.subr.mxu1 %v93_v6 }
  0x64   :  { %204 = vmatpush2.msra.mxu0 %v92_v7  ;;  %313 = vmatpush2.msra.mxu1 %v92_v7 }
  0x65   :  { %205 = vmatprep.subr.mxu0 %v91_v8  ;;  %314 = vmatprep.subr.mxu1 %v91_v8 }
  0x66   :  { %206 = vmatpush2.msra.mxu0 %v90_v10  ;;  %207 = vmatprep.mubr.f32.mxu0 %v140_v9 }
  0x67   :  { %315 = vmatpush2.msra.mxu1 %v90_v10  ;;  %316 = vmatprep.mubr.f32.mxu1 %v249_v11 }
  0x68   :  { %208 = vmatmul.mubr.f32.vlgmr.msra.gmra.mxu0 %v139_v3  ;;  %317 = vmatmul.mubr.f32.vlgmr.msra.gmra.mxu1 %v248_v5 }
 0x128   :  { %v209_v24 = vpop.f32.mrf.mxu0  ;;  %v318_v25 = vpop.f32.mrf.mxu1 }
 0x129   :  { %v214_v26 = vmul.f32 2e-05, %v209_v24  ;;  %v323_v27 = vmul.f32 5e-06, %v318_v25 }
 0x12a   :  { %v211_v30 = vpop.f32.mrf.mxu0  ;;  %v320_v31 = vpop.f32.mrf.mxu1 }
 0x12b   :  { %v227_v34 = vsub.f32 %v214_v26, %v223_v21  ;;  %v338_v35 = vsub.f32 %v323_v27, %v334_v22  ;;  %v215_v36 = vmul.f32 2e-05, %v211_v30  ;;  %v324_v37 = vmul.f32 5e-06, %v320_v31 }
 0x12d   :  { %v228_v38 = vsub.f32 %v215_v36, %v224_v28  ;;  %v339_v39 = vsub.f32 %v324_v37, %v335_v29  ;;  %v352_v40 = vadd.f32 %v348_v23, %v338_v35 }
 0x12f   :  { %v231_v41 = vcombine.low %v227_v34, %v228_v38  ;;  %v353_v42 = vadd.f32 %v349_v32, %v339_v39 }
 0x131   :  { %v356_v44 = vcombine.low %v352_v40, %v353_v42  ;;  %v238_v45 = vrot.slane %v231_v41, %v561_v60 }
 0x133   :  { %v240_v46 = vadd.f32 %v238_v45, %v131_v43  ;;  %v363_v47 = vrot.slane %v356_v44, %v561_v60 }
 0x135   :  { %366 = vst [vmem:[#allocation8] sm:$0xf] %v240_v46  ;;  %v365_v48 = vadd.f32 %v363_v47, %v563_v0 }
 0x136   :  { %477 = shalt.err (!%p474_p5)
}
 0x137   :  { %377 = dma.vmem_to_hbm [thread:$0]  %s375_s9, 64, %s591_s4, [#allocation4]   ;;  %367 = vst [vmem:[#allocation9] sm:$0xf] %v365_v48 }
 0x138   :  { %s486_s15 = scalar_lea.vmem %s385_s11, 64  ;;  %p491_p7 = scmp.lt.s32.totalorder %s385_s11, %s385_s11 }
 0x139   :  { %p487_p6 = scmp.ne.s32.totalorder %s385_s11, %s486_s15  ;;  %p492_p8 = scmp.lt.s32.totalorder %s486_s15, %s486_s15 }
 0x13b   :  { %p493_p9 = por %p492_p8, %p491_p7 }
 0x13d   :  { %p494_p10 = pnand %p493_p9, %p487_p6 }
 0x13f   :  { %497 = shalt.err (!%p494_p10)
}
 0x140   :  { %387 = dma.vmem_to_hbm [thread:$0]  %s385_s11, 64, %s592_s5, [#allocation10]  }
 0x141   :  { %510 = dma.done.wait [#allocation4], 64  }
 0x142   :  { %511 = vsyncadd [#allocation4], 4294967232 }
 0x143   :  { %512 = dma.done.wait [#allocation10], 64  }
 0x144   :  { %513 = vsyncadd [#allocation10], 4294967232 }
 0x145   :  { %394 = vsyncpa [#allocation3], 1 }
 0x146   :  { %395 = vsyncpa [#allocation6], 1 }
 0x147   :  { %396 = vsyncpa [#allocation4], 1 }
 0x148   :  { %397 = vsyncpa [#allocation10], 1 }

</bundles_post_ra>
